<compile_context>
chip_gen: v5e
topology: v5e:2x2
jax: 0.10.0
libtpu: 0.0.40
codegen_flags: <defaults>
</compile_context>

<pallas_src>
import jax
import jax.numpy as jnp
from jax.experimental import pallas as pl
from jax.experimental.pallas import tpu as pltpu

_LANE = 128
_MiB = 1 << 20
_SMALL_BYTES = 1 * _MiB  # below this total traffic, XLA's fused add beats pallas_call overhead


def _add_pos_kernel(x_ref, pos_ref, o_ref):
    # Elementwise VPU add in the (promoted) output dtype; pos broadcasts over the batch dim.
    o_ref[...] = x_ref[...].astype(o_ref.dtype) + pos_ref[...].astype(o_ref.dtype)


def _round_up(v: int, m: int) -> int:
    return ((v + m - 1) // m) * m


def _target_tile_bytes() -> int:
    # v7x (64 MiB VMEM per TC, 3.2 TB/s HBM): bigger steps amortize the ~0.35us fixed
    # per-step cost. v5e/v6e: 2 MiB is already at the measured f32-add roofline plateau.
    try:
        vmem = getattr(pltpu.get_tpu_info(), "vmem_capacity_bytes", None)
    except Exception:
        vmem = None
    if vmem is not None and vmem <= 80 * _MiB:
        return 4 * _MiB
    return 2 * _MiB


def _compiler_params(buf_bytes: int) -> pltpu.CompilerParams:
    # buf_bytes = single-copy sum of the x / pos / out blocks; double-buffering doubles it.
    limit = int(min(60 * _MiB, max(16 * _MiB, 3 * buf_bytes + 4 * _MiB)))
    return pltpu.CompilerParams(
        dimension_semantics=("parallel", "parallel"),
        vmem_limit_bytes=limit,
    )


def learnable_positional_embedding(x: jax.Array, pos_embedding: jax.Array,
                                   *, small_bytes: int = _SMALL_BYTES) -> jax.Array:
    """x: [B, S, D], pos_embedding: [1, max_len, D] -> [B, S, D] (+ dtype promotion)."""
    B, S, D = x.shape
    assert pos_embedding.ndim == 3 and pos_embedding.shape[0] == 1 and pos_embedding.shape[2] == D
    max_len = pos_embedding.shape[1]
    assert S <= max_len, "seq_len exceeds max_len"

    # PyTorch-style type promotion (e.g. bf16 x + f32 pos -> f32), applied inside the kernel.
    out_dtype = jnp.promote_types(x.dtype, pos_embedding.dtype)
    x_isz = jnp.dtype(x.dtype).itemsize
    p_isz = jnp.dtype(pos_embedding.dtype).itemsize
    o_isz = jnp.dtype(out_dtype).itemsize
    # Sublane packing multiple for the narrowest streamed dtype (f32:8, bf16:16, int8:32).
    pack = 8 * max(1, 4 // min(x_isz, p_isz, o_isz))

    total_bytes = B * S * D * (x_isz + o_isz) + S * D * p_isz
    if total_bytes <= small_bytes:
        # Tiny problem: fixed pallas custom-call + unpipelined single-step DMA dominates a
        # sub-microsecond add; XLA's fused elementwise add has ~zero extra launch cost.
        return (x + pos_embedding[:, :S, :]).astype(out_dtype)

    target = _target_tile_bytes()

    if D % _LANE == 0:
        # ---------- 3-D tiled path (D already lane-dense) ----------
        plane_bytes = S * D * o_isz
        if plane_bytes >= target:
            # Long sequences: one batch plane per step, tile the sequence to ~target bytes.
            tb = 1
            rows = max(pack, ((target // (D * o_isz)) // pack) * pack)
            ts = min(_round_up(S, pack), rows)
        else:
            # Short sequences: pack several whole (S, D) planes per step (contiguous in HBM)
            # so step size stays near the target instead of capping at one plane.
            ts = _round_up(S, pack)
            tb = max(1, min(B, target // (ts * D * o_isz)))

        grid = (pl.cdiv(S, ts), pl.cdiv(B, tb))  # seq (pos-varying) OUTER, batch INNER
        buf_bytes = tb * ts * D * (x_isz + o_isz) + ts * D * p_isz

        return pl.pallas_call(
            _add_pos_kernel,
            out_shape=jax.ShapeDtypeStruct((B, S, D), out_dtype),
            grid_spec=pltpu.PrefetchScalarGridSpec(
                num_scalar_prefetch=0,
                grid=grid,
                in_specs=[
                    pl.BlockSpec((tb, ts, D), lambda s, b: (b, s, 0)),  # x batch/seq tile
                    pl.BlockSpec((1, ts, D), lambda s, b: (0, s, 0)),   # pos tile, reused across b
                ],
                out_specs=pl.BlockSpec((tb, ts, D), lambda s, b: (b, s, 0)),
            ),
            compiler_params=_compiler_params(buf_bytes),
        )(x, pos_embedding)

    # ---------- Lane-dense flattened path (D not a multiple of 128) ----------
    # The add is elementwise, so flattening (S, D) -> S*D is pure layout plumbing; it turns
    # masked partial stores (e.g. D=32 -> 32/128 lanes) into full-width stores.
    N = S * D
    x2d = x.reshape(B, N)                           # contiguous reshape: free
    pos2d = pos_embedding.reshape(1, max_len * D)   # contiguous reshape: free, NO slice copy

    n_full = _round_up(N, _LANE)
    # Keep each per-row DMA run >= ~2 KiB contiguous so HBM bursts stay long.
    min_tn = max(_LANE, _round_up(2048 // x_isz, _LANE))

    tn_cap = ((target // (B * o_isz)) // _LANE) * _LANE
    if tn_cap >= min_tn or tn_cap >= n_full:
        # Keep all batch rows per block so each pos lane chunk is DMA'd exactly once.
        tb = B
        tn = min(n_full, max(tn_cap, _LANE))
    else:
        # Huge batch: keep lanes wide and shrink the batch rows (sublane-packing multiple).
        tn = min(n_full, min_tn)
        tb = min(B, max(pack, ((target // (tn * o_isz)) // pack) * pack))

    grid = (pl.cdiv(N, tn), pl.cdiv(B, tb))  # pos-varying lane axis OUTER, batch INNER
    buf_bytes = tb * tn * (x_isz + o_isz) + tn * p_isz

    out2d = pl.pallas_call(
        _add_pos_kernel,
        out_shape=jax.ShapeDtypeStruct((B, N), out_dtype),
        grid_spec=pltpu.PrefetchScalarGridSpec(
            num_scalar_prefetch=0,
            grid=grid,
            in_specs=[
                pl.BlockSpec((tb, tn), lambda n, b: (b, n)),  # x rows / lane chunk
                pl.BlockSpec((1, tn), lambda n, b: (0, n)),   # pos: constant across inner b
            ],
            out_specs=pl.BlockSpec((tb, tn), lambda n, b: (b, n)),
        ),
        compiler_params=_compiler_params(buf_bytes),
    )(x2d, pos2d)
    return out2d.reshape(B, S, D)


if __name__ == "__main__":
    key = jax.random.PRNGKey(0)
    k0, k1, k2, k3, k4, k5 = jax.random.split(key, 6)

    # --- Test 1: module-spec small shape (B=2, S=8, D=32) ---
    max_len, d_model, batch, seq_len = 16, 32, 2, 8
    pos = jax.random.normal(k0, (1, max_len, d_model), dtype=jnp.float32)
    x = jax.random.normal(k1, (batch, seq_len, d_model), dtype=jnp.float32)
    ref = x + pos[:, :seq_len, :]

    # Default: tiny -> XLA fused-add fallback.
    out = jax.block_until_ready(learnable_positional_embedding(x, pos))
    assert out.shape == (batch, seq_len, d_model)
    assert jnp.allclose(out, ref, atol=1e-6), "mismatch vs reference (small/XLA path)"

    # Forced through the Pallas lane-dense flattened path.
    out_p = jax.block_until_ready(learnable_positional_embedding(x, pos, small_bytes=0))
    assert jnp.allclose(out_p, ref, atol=1e-6), "mismatch vs reference (flattened path)"

    # --- Test 2: D multiple of 128 -> 3-D tiled path, batch planes packed, ragged S ---
    pos2 = jax.random.normal(k2, (1, 640, 128), dtype=jnp.float32)
    x2 = jax.random.normal(k3, (4, 513, 128), dtype=jnp.float32)
    out2 = jax.block_until_ready(learnable_positional_embedding(x2, pos2, small_bytes=0))
    ref2 = x2 + pos2[:, :513, :]
    assert out2.shape == x2.shape
    assert jnp.allclose(out2, ref2, atol=1e-6), "mismatch vs reference (3-D tiled path)"

    # --- Test 3: D not multiple of 128, mixed dtypes (bf16 x + f32 pos -> f32 promotion) ---
    pos3 = jax.random.normal(k4, (1, 384, 96), dtype=jnp.float32)
    x3 = jax.random.normal(k5, (8, 300, 96), dtype=jnp.float32).astype(jnp.bfloat16)
    out3 = jax.block_until_ready(learnable_positional_embedding(x3, pos3, small_bytes=0))
    ref3 = x3.astype(jnp.float32) + pos3[:, :300, :]
    assert out3.dtype == jnp.float32
    assert jnp.allclose(out3, ref3, atol=1e-6), "mismatch vs reference (flattened, promoted)"

    print("KERNEL_OK")
</pallas_src>

<mosaic_0001>
module attributes {stable_mosaic.version = 11 : i64} {
  func.func @_add_pos_kernel(%arg0: i32, %arg1: i32, %arg2: memref<2x256xf32, #tpu.memory_space<vmem>>, %arg3: memref<1x256xf32, #tpu.memory_space<vmem>>, %arg4: memref<2x256xf32, #tpu.memory_space<vmem>>) attributes {dimension_semantics = [#tpu.dimension_semantics<parallel>, #tpu.dimension_semantics<parallel>], iteration_bounds = array<i64: 1, 1>, scalar_prefetch = 0 : i64, scratch_operands = 0 : i64, tpu.core_type = #tpu.core_type<tc>, window_params = [{transform_indices = @transform_0, window_bounds = array<i64: 2, 256>}, {transform_indices = @transform_1, window_bounds = array<i64: 1, 256>}, {transform_indices = @transform_2, window_bounds = array<i64: 2, 256>}]} {
    %c0 = arith.constant 0 : index
    %c0_0 = arith.constant 0 : index
    %0 = vector.load %arg2[%c0, %c0_0] : memref<2x256xf32, #tpu.memory_space<vmem>>, vector<2x256xf32>
    %c0_1 = arith.constant 0 : index
    %c0_2 = arith.constant 0 : index
    %1 = vector.load %arg3[%c0_1, %c0_2] : memref<1x256xf32, #tpu.memory_space<vmem>>, vector<1x256xf32>
    %2 = vector.broadcast %1 : vector<1x256xf32> to vector<2x256xf32>
    %3 = arith.addf %0, %2 : vector<2x256xf32>
    %c0_3 = arith.constant 0 : index
    %c0_4 = arith.constant 0 : index
    %4 = vector.load %arg4[%c0_3, %c0_4] : memref<2x256xf32, #tpu.memory_space<vmem>>, vector<2x256xf32>
    tpu.vector_store %arg4[%c0_3, %c0_4], %3 {strides = array<i32>} : memref<2x256xf32, #tpu.memory_space<vmem>>, vector<2x256xf32>,
    return
  }
  func.func @transform_0(%arg0: i32, %arg1: i32) -> (i32, i32) {
    %c0_i32 = arith.constant 0 : i32
    return %arg1, %arg0 : i32, i32
  }
  func.func @transform_1(%arg0: i32, %arg1: i32) -> (i32, i32) {
    %c0_i32 = arith.constant 0 : i32
    %c0_i32_0 = arith.constant 0 : i32
    return %c0_i32, %arg0 : i32, i32
  }
  func.func @transform_2(%arg0: i32, %arg1: i32) -> (i32, i32) {
    %c0_i32 = arith.constant 0 : i32
    return %arg1, %arg0 : i32, i32
  }
}

</mosaic_0001>

<bundles_post_ra>
// kernel: tpu_custom_call.1
= control target key start
LH: loop header
LB: loop body
LE: loop exit
PB: predicated region body
PF: predicated region fallthrough
CT: control target
= control target key end

     0   :  { %7 = vsyncpa [#allocation3], 0  ;;  %s177_s0 = inlined_call_operand.hbm [shape: f32[2,256], index: 0, kind: input, shape index: {}]   ;;  %s178_s1 = inlined_call_operand.hbm [shape: f32[1,512], index: 1, kind: input, shape index: {}]   ;;  %s179_s2 = inlined_call_operand.hbm [shape: f32[2,256], index: 2, kind: output, shape index: {}]  }
   0x1   :  { %8 = vsyncpa [#allocation6], 0 }
   0x2   :  { %9 = vsyncpa [#allocation4], 0  ;;  %s15_s11 = sshll.u32 %s177_s0, 4  ;;  %s150_s12 = smov [#allocation2]   ;;  %s16_s11 = int_to_ptr.hbm [resolvable:$true] %s15_s11 }
   0x3   :  { %s17_s13 = sshll.u32 %s150_s12, 4  ;;  %s26_s16 = sshll.u32 %s178_s1, 4  ;;  %s18_s13 = int_to_ptr.vmem [resolvable:$true] %s17_s13  ;;  %s27_s16 = int_to_ptr.hbm [resolvable:$true] %s26_s16 }
   0x4   :  { %20 = dma.hbm_to_vmem [thread:$0]  %s16_s11, 64, %s18_s13, [#allocation3]  }
   0x5   :  { %s151_s17 = smov [#allocation5]  }
   0x6   :  { %s28_s18 = sshll.u32 %s151_s17, 4  ;;  %s29_s18 = int_to_ptr.vmem [resolvable:$true] %s28_s18 }
   0x7   :  { %31 = dma.hbm_to_vmem [thread:$0]  %s27_s16, 32, %s29_s18, [#allocation6]  }
   0x8   :  { %144 = dma.done.wait [#allocation3], 64  }
   0x9   :  { %145 = vsyncadd [#allocation3], 4294967232 }
   0xa   :  { %146 = dma.done.wait [#allocation6], 32  }
   0xb   :  { %147 = vsyncadd [#allocation6], 4294967264  ;;  %v41_v0 = vld [vmem:[#allocation5] sm:$0x3]  ;;  %vm46_vm0 = vcmask 1041408   ;;  %s152_s0 = smov [#allocation7]  }
   0xc   :  { %v43_v1 = vperm.slane %v41_v0, 0  ;;  %v44_v2 = vperm.slane %v41_v0, 1  ;;  %v40_v3 = vld [vmem:[#allocation2] sm:$0xf]  ;;  %s56_s19 = sshll.u32 %s152_s0, 4  ;;  %s58_s21 = sshll.u32 %s179_s2, 4  ;;  %s57_s19 = int_to_ptr.vmem [resolvable:$true] %s56_s19  ;;  %s59_s21 = int_to_ptr.hbm [resolvable:$true] %s58_s21 }
   0xe   :  { %v45_v4 = vrot.slane %v44_v2, 6 }
  0x10   :  { %v47_v5 = vsel %vm46_vm0, %v43_v1, %v45_v4 }
  0x11   :  { %v49_v6 = vadd.f32 %v47_v5, %v40_v3 }
  0x13   :  { %50 = vst [vmem:[#allocation7] sm:$0xf] %v49_v6 }
  0x14   :  { %61 = dma.vmem_to_hbm [thread:$0]  %s57_s19, 64, %s59_s21, [#allocation4]  }
  0x15   :  { %148 = dma.done.wait [#allocation4], 64  }
  0x16   :  { %149 = vsyncadd [#allocation4], 4294967232 }
  0x17   :  { %66 = vsyncpa [#allocation3], 1 }
  0x18   :  { %67 = vsyncpa [#allocation6], 1 }
  0x19   :  { %68 = vsyncpa [#allocation4], 1 }

</bundles_post_ra>
